<compile_context>
chip_gen: v5e
topology: v5e:2x2
jax: 0.10.0
libtpu: 0.0.40
codegen_flags: <defaults>
</compile_context>

<pallas_src>
import functools

import numpy as np
import jax
import jax.numpy as jnp
from jax import lax
from jax.experimental import pallas as pl
from jax.experimental.pallas import tpu as pltpu


VMEM_LIMIT = 32 * 1024 * 1024   # safe on v7x (64 MiB/TC) and v5e/v6e (128 MiB)


# ------------------------------- helpers ------------------------------------

def _round_up(x, m):
    return ((x + m - 1) // m) * m


def _itemsize(dt):
    return np.dtype(dt).itemsize


def _pad2d(x, rows, cols, dtype):
    """Cast + zero-pad to [rows, cols]. No-op fast path if already padded."""
    r, c = x.shape
    x = x.astype(dtype)
    if (r, c) != (rows, cols):
        x = jnp.pad(x, ((0, rows - r), (0, cols - c)))
    return x


def adj_tiles(n):
    """Padded size + streaming tiles (tm, tk) for a square [n, n] adjacency.

    n_pad is a multiple of 512 so tm=512 always divides it; tk=1024 when it
    divides (perf review), else 512.  For realistic node counts (n >= 1024)
    this gives >= 2 blocks along M so both v7x TensorCores get grid work even
    though the N grid collapses to a single 128-wide block.
    """
    n_pad = _round_up(max(n, 1), 512)
    tm = 512
    tk = 1024 if n_pad % 1024 == 0 else 512
    return tm, tk, n_pad


# --------------------- generic tiled matmul (init-time KNN) ------------------

def _mm_kernel(a_ref, b_ref, o_ref, acc_ref):
    @pl.when(pl.program_id(2) == 0)
    def _():
        acc_ref[...] = jnp.zeros_like(acc_ref)

    acc_ref[...] += jnp.dot(a_ref[...], b_ref[...],
                            preferred_element_type=jnp.float32)

    @pl.when(pl.program_id(2) == pl.num_programs(2) - 1)
    def _():
        o_ref[...] = acc_ref[...].astype(o_ref.dtype)


def pallas_matmul(a, b, *, out_dtype=jnp.float32, tm=256, tn=256, tk=512):
    """a[M,K] @ b[K,N] -> out_dtype[M,N]; bf16 MXU operands, f32 accumulation."""
    M, K = a.shape
    K2, N = b.shape
    assert K == K2, (a.shape, b.shape)
    tm = min(tm, _round_up(M, 16))
    tn = min(tn, _round_up(N, 128))
    tk = min(tk, _round_up(K, 128))
    Mp, Np, Kp = _round_up(M, tm), _round_up(N, tn), _round_up(K, tk)
    a_p = _pad2d(a, Mp, Kp, jnp.bfloat16)
    b_p = _pad2d(b, Kp, Np, jnp.bfloat16)
    gm, gn, gk = Mp // tm, Np // tn, Kp // tk
    cost = pl.CostEstimate(
        flops=int(2 * Mp * Np * Kp),
        transcendentals=0,
        bytes_accessed=int(2 * Mp * Kp * gn + 2 * Kp * Np * gm
                           + _itemsize(out_dtype) * Mp * Np))
    out = pl.pallas_call(
        _mm_kernel,
        out_shape=jax.ShapeDtypeStruct((Mp, Np), out_dtype),
        grid_spec=pltpu.PrefetchScalarGridSpec(
            num_scalar_prefetch=0,
            grid=(gm, gn, gk),
            in_specs=[pl.BlockSpec((tm, tk), lambda i, j, k: (i, k)),
                      pl.BlockSpec((tk, tn), lambda i, j, k: (k, j))],
            out_specs=pl.BlockSpec((tm, tn), lambda i, j, k: (i, j)),
            scratch_shapes=[pltpu.VMEM((tm, tn), jnp.float32)]),
        compiler_params=pltpu.CompilerParams(
            dimension_semantics=("parallel", "parallel", "arbitrary"),
            vmem_limit_bytes=VMEM_LIMIT),
        cost_estimate=cost,
    )(a_p, b_p)
    return out[:M, :N]


# --------- adjacency propagation kernel (A @ X, optional fused L2 norm) ------

def _make_prop_kernel(normalize):
    def kernel(a_ref, x_ref, o_ref, acc_ref):
        @pl.when(pl.program_id(1) == 0)
        def _():
            acc_ref[...] = jnp.zeros_like(acc_ref)

        acc_ref[...] += jnp.dot(a_ref[...], x_ref[...],
                                preferred_element_type=jnp.float32)

        @pl.when(pl.program_id(1) == pl.num_programs(1) - 1)
        def _():
            acc = acc_ref[...]
            if normalize:
                # F.normalize(p=2, dim=1): x / max(||x||, 1e-12).  Padded
                # columns are zero so they do not change the norm; padded
                # (all-zero) rows stay zero.
                nrm = jnp.sqrt(jnp.sum(acc * acc, axis=1, keepdims=True))
                acc = acc / jnp.maximum(nrm, 1e-12)
            o_ref[...] = acc.astype(o_ref.dtype)
    return kernel


def pallas_adj_prop(adj_p, x, *, tm, tk, normalize=False, out_dtype=jnp.float32):
    """out = (optionally row-L2-normalized) adj_p @ x, shapes kept padded.

    adj_p must be pre-padded bf16 [Mp, Kp] (cast once at init / construction,
    NOT per call).  x may be unpadded f32 or the already-padded bf16 output of
    a previous call (fast path: no pad/cast emitted).
    """
    assert adj_p.dtype == jnp.bfloat16
    Mp, Kp = adj_p.shape
    assert Mp % tm == 0 and Kp % tk == 0, (adj_p.shape, tm, tk)
    D = x.shape[1]
    Dp = _round_up(D, 128)
    x_p = _pad2d(x, Kp, Dp, jnp.bfloat16)
    gm, gk = Mp // tm, Kp // tk
    cost = pl.CostEstimate(
        flops=int(2 * Mp * Kp * Dp),
        transcendentals=0,
        bytes_accessed=int(2 * Mp * Kp + 2 * Kp * Dp * gm
                           + _itemsize(out_dtype) * Mp * Dp))
    out = pl.pallas_call(
        _make_prop_kernel(normalize),
        out_shape=jax.ShapeDtypeStruct((Mp, Dp), out_dtype),
        grid_spec=pltpu.PrefetchScalarGridSpec(
            num_scalar_prefetch=0,
            grid=(gm, gk),
            in_specs=[pl.BlockSpec((tm, tk), lambda i, k: (i, k)),
                      pl.BlockSpec((tk, Dp), lambda i, k: (k, 0))],
            out_specs=pl.BlockSpec((tm, Dp), lambda i, k: (i, 0)),
            scratch_shapes=[pltpu.VMEM((tm, Dp), jnp.float32)]),
        compiler_params=pltpu.CompilerParams(
            dimension_semantics=("parallel", "arbitrary"),
            vmem_limit_bytes=VMEM_LIMIT),
        cost_estimate=cost,
    )(adj_p, x_p)
    return out          # padded [Mp, Dp]; caller slices only at the very end


# ---------------- fused GCNConv kernel: (Ahat @ X) @ W^T + b -----------------

def _gcn_fused_kernel(a_ref, x_ref, wt_ref, b_ref, o_ref, acc_ref):
    @pl.when(pl.program_id(1) == 0)
    def _():
        acc_ref[...] = jnp.zeros_like(acc_ref)

    acc_ref[...] += jnp.dot(a_ref[...], x_ref[...],
                            preferred_element_type=jnp.float32)

    @pl.when(pl.program_id(1) == pl.num_programs(1) - 1)
    def _():
        # weight matmul + bias in the finalize: the Ahat@X intermediate never
        # touches HBM; wt (Dp x Dp bf16) stays resident in VMEM.
        xw = jnp.dot(acc_ref[...].astype(jnp.bfloat16), wt_ref[...],
                     preferred_element_type=jnp.float32)
        o_ref[...] = (xw + b_ref[...]).astype(o_ref.dtype)


def pallas_gcn_conv(adj_p, x, wt_p, bias_p, *, tm, tk, out_dtype=jnp.bfloat16):
    """GCNConv(aggr='add') as ONE fused kernel: Ahat @ X @ W^T + b.

    Uses (Ahat @ X) @ W^T == Ahat @ (X @ W^T); adjacency streamed in (tm, tk)
    bf16 blocks, f32 VMEM accumulator across the k grid axis.
    """
    assert adj_p.dtype == jnp.bfloat16 and wt_p.dtype == jnp.bfloat16
    Mp, Kp = adj_p.shape
    Dp = wt_p.shape[0]
    assert wt_p.shape == (Dp, Dp) and bias_p.shape == (1, Dp)
    assert Mp % tm == 0 and Kp % tk == 0, (adj_p.shape, tm, tk)
    x_p = _pad2d(x, Kp, Dp, jnp.bfloat16)
    gm, gk = Mp // tm, Kp // tk
    cost = pl.CostEstimate(
        flops=int(2 * Mp * Kp * Dp + 2 * Mp * Dp * Dp),
        transcendentals=0,
        bytes_accessed=int(2 * Mp * Kp + 2 * Kp * Dp * gm + 2 * Dp * Dp
                           + 4 * Dp + _itemsize(out_dtype) * Mp * Dp))
    out = pl.pallas_call(
        _gcn_fused_kernel,
        out_shape=jax.ShapeDtypeStruct((Mp, Dp), out_dtype),
        grid_spec=pltpu.PrefetchScalarGridSpec(
            num_scalar_prefetch=0,
            grid=(gm, gk),
            in_specs=[pl.BlockSpec((tm, tk), lambda i, k: (i, k)),
                      pl.BlockSpec((tk, Dp), lambda i, k: (k, 0)),
                      pl.BlockSpec((Dp, Dp), lambda i, k: (0, 0)),
                      pl.BlockSpec((1, Dp), lambda i, k: (0, 0))],
            out_specs=pl.BlockSpec((tm, Dp), lambda i, k: (i, 0)),
            scratch_shapes=[pltpu.VMEM((tm, Dp), jnp.float32)]),
        compiler_params=pltpu.CompilerParams(
            dimension_semantics=("parallel", "arbitrary"),
            vmem_limit_bytes=VMEM_LIMIT),
        cost_estimate=cost,
    )(adj_p, x_p, wt_p, bias_p)
    return out          # padded [Mp, Dp]


# --------------------------- graph / adjacency glue --------------------------

def build_normalized_adj(edge_u, edge_i_abs, edge_w, n_nodes, n_pad):
    """Dense D^-1/2 (A + I) D^-1/2 from edge weights, built directly at padded
    size and cast to bf16 exactly once (O(E) degree math + one N^2 scatter)."""
    deg = jnp.zeros((n_pad,), jnp.float32).at[:n_nodes].set(1.0)   # self loops
    deg = deg.at[edge_u].add(edge_w)
    deg = deg.at[edge_i_abs].add(edge_w)
    dr = lax.rsqrt(jnp.maximum(deg, 1e-12))
    vals = edge_w * dr[edge_u] * dr[edge_i_abs]
    adj = jnp.zeros((n_pad, n_pad), jnp.float32)
    adj = adj.at[edge_i_abs, edge_u].add(vals)
    adj = adj.at[edge_u, edge_i_abs].add(vals)
    diag = jnp.where(jnp.arange(n_pad) < n_nodes, dr * dr, 0.0)
    adj = adj + jnp.diag(diag)
    return adj.astype(jnp.bfloat16)                                # cast once


def knn_normalized_adj(feat, k, n_pad):
    """Init-time dense equivalent of get_knn_adj_mat + normalized laplacian,
    built at padded size (cast to bf16 happens once, by the caller)."""
    n = feat.shape[0]
    cn = feat / jnp.linalg.norm(feat, axis=-1, keepdims=True)
    sim = pallas_matmul(cn, cn.T)                                 # [n, n] f32
    _, knn_ind = lax.top_k(sim, k)                                # [n, k]
    rows = jnp.repeat(jnp.arange(n), k)
    cols = knn_ind.reshape(-1)
    row_sum = jnp.zeros((n,), jnp.float32).at[rows].add(1.0) + 1e-07
    r_inv_sqrt = row_sum ** -0.5
    vals = r_inv_sqrt[rows] * r_inv_sqrt[cols]
    adj = jnp.zeros((n_pad, n_pad), jnp.float32).at[rows, cols].set(vals)
    return adj


# ------------------------------ parameter setup ------------------------------

def xavier_normal(key, shape):
    fan_out, fan_in = shape
    std = (2.0 / (fan_in + fan_out)) ** 0.5
    return std * jax.random.normal(key, shape, dtype=jnp.float32)


def build_params(key, num_user, num_item, dim_E, feat_E, v_dim, t_dim, n_layers):
    ks = jax.random.split(key, 8 + 2 * n_layers)
    return {
        "user_emb": xavier_normal(ks[0], (num_user, dim_E)),
        "item_emb": xavier_normal(ks[1], (num_item, dim_E)),
        "W_img": xavier_normal(ks[2], (feat_E, v_dim)),
        "b_img": 0.01 * jax.random.normal(ks[3], (feat_E,), jnp.float32),
        "W_txt": xavier_normal(ks[4], (feat_E, t_dim)),
        "b_txt": 0.01 * jax.random.normal(ks[5], (feat_E,), jnp.float32),
        "conv_W": [xavier_normal(ks[8 + l], (dim_E, dim_E)) for l in range(n_layers)],
        "conv_b": [jnp.zeros((dim_E,), jnp.float32) for _ in range(n_layers)],
    }


# --------------------------------- forward -----------------------------------

def ddrec_forward(params, v_feat, t_feat, mm_adj_p, image_adj_p, text_adj_p,
                  edge_u, edge_i_abs, threshold, *,
                  num_user, num_item, n_layers, mm_layers,
                  item_tiles, node_tiles):
    n_nodes = num_user + num_item
    edge_i_rel = edge_i_abs - num_user
    dim_E = params["item_emb"].shape[1]
    Dp = _round_up(dim_E, 128)
    tm_i, tk_i, item_pad = item_tiles
    tm_n, tk_n, node_pad = node_tiles
    del item_pad, node_pad  # encoded in the pre-padded adjacency shapes

    # Modal feature transforms (nn.Linear): tiny matmuls left to XLA on
    # purpose (perf review: K,N pad to 128 -> >=75% zero MXU work and the
    # pallas_call glue exceeds the matmul itself).
    v_emb = v_feat @ params["W_img"].T + params["b_img"]
    t_emb = t_feat @ params["W_txt"].T + params["b_txt"]
    # TODO(synk): guide_image_trs / guide_text_trs gating only applies on the
    # 2nd+ forward call (final_i_g_embeddings cached); first-call path here.
    visual_tensor, text_tensor = v_emb, t_emb

    # Per-forward one-time prep: conv weights transposed + padded bf16, biases
    # padded f32 (kept resident in VMEM by the fused GCN kernel).
    conv_wt_p = [_pad2d(jnp.transpose(W), Dp, Dp, jnp.bfloat16)
                 for W in params["conv_W"]]
    conv_b_p = [_pad2d(b.reshape(1, -1), 1, Dp, jnp.float32)
                for b in params["conv_b"]]

    # Multimodal item-item propagation; F.normalize(p=2, dim=1) fused into the
    # finalize of the LAST hop; multi-hop intermediates stay padded bf16.
    def mm_propagate(adj_p, x0):
        h = x0
        for l in range(mm_layers):
            last = l == mm_layers - 1
            h = pallas_adj_prop(adj_p, h, tm=tm_i, tk=tk_i, normalize=last,
                                out_dtype=jnp.float32 if last else jnp.bfloat16)
        return h                                        # padded [item_pad, Dp]

    h_p = mm_propagate(mm_adj_p, params["item_emb"])
    h1_p = mm_propagate(image_adj_p, v_emb)
    h2_p = mm_propagate(text_adj_p, t_emb)
    # TODO(synk): for mm_layers == 1, mm_adj = w*image_adj + (1-w)*text_adj can
    # be folded into the image/text propagations (64-wide RHS) to avoid
    # streaming mm_adj at all; kept explicit here for arbitrary mm_layers.

    def gcn_branch(item_side_emb, adj_p_fixed=None):
        ego0 = jnp.concatenate([params["user_emb"], item_side_emb], axis=0)
        ego_p = _pad2d(ego0, tk_n * ((adj_p_fixed.shape[1] // tk_n)
                                     if adj_p_fixed is not None else 0) or
                       _round_up(n_nodes, 512), Dp, jnp.bfloat16) \
            if False else _pad2d(ego0, node_tiles[2], Dp, jnp.bfloat16)
        acc_p = _pad2d(ego0, node_tiles[2], Dp, jnp.float32)   # layer-sum in f32
        for l in range(n_layers):
            if adj_p_fixed is None:
                # filter_edges: O(E*D) edge similarity (no dense U x I matrix),
                # mask >= threshold, then rebuild the normalized adjacency.
                user_e = ego_p[:num_user].astype(jnp.float32)
                item_e = ego_p[num_user:num_user + num_item].astype(jnp.float32)
                edge_sim = jnp.sum(user_e[edge_u] * item_e[edge_i_rel], axis=-1)
                w = (edge_sim >= threshold).astype(jnp.float32)
                adj_p = build_normalized_adj(edge_u, edge_i_abs, w,
                                             n_nodes, node_tiles[2])
            else:
                adj_p = adj_p_fixed
            ego_p = pallas_gcn_conv(adj_p, ego_p, conv_wt_p[l], conv_b_p[l],
                                    tm=tm_n, tk=tk_n, out_dtype=jnp.bfloat16)
            acc_p = acc_p + ego_p.astype(jnp.float32)
        mean = (acc_p / float(n_layers + 1))[:n_nodes, :dim_E]
        return mean[:num_user], mean[num_user:]

    u_v, i_v = gcn_branch(visual_tensor)
    i_v = i_v + h1_p[:num_item, :dim_E]
    u_t, i_t = gcn_branch(text_tensor)
    i_t = i_t + h2_p[:num_item, :dim_E]

    # id-embedding branch: full-graph adjacency built + cast bf16 ONCE per
    # forward, reused for all n_layers convolutions.
    ones_w = jnp.ones(edge_u.shape, jnp.float32)
    adj_full_p = build_normalized_adj(edge_u, edge_i_abs, ones_w,
                                      n_nodes, node_tiles[2])
    u_g, i_g = gcn_branch(params["item_emb"], adj_p_fixed=adj_full_p)
    final_i_g = i_g + h_p[:num_item, :dim_E]

    i_all = jnp.concatenate([final_i_g, i_v, i_t], axis=1)
    u_all = jnp.concatenate([u_g, u_v, u_t], axis=1)
    return jnp.concatenate([u_all, i_all], axis=0)


# ----------------------------------- main ------------------------------------

if __name__ == "__main__":
    num_user, num_item = 8, 16
    dim_E = feat_E = 32          # must be equal (user/item embeddings concatenated)
    v_dim, t_dim = 64, 48
    n_layers, mm_layers = 2, 1
    knn_k = 10
    mm_image_weight = 0.4
    threshold = 0.0

    key = jax.random.PRNGKey(0)
    k_par, k_v, k_t = jax.random.split(key, 3)

    params = build_params(k_par, num_user, num_item, dim_E, feat_E,
                          v_dim, t_dim, n_layers)
    v_feat = jax.random.normal(k_v, (num_item, v_dim), jnp.float32)
    t_feat = jax.random.normal(k_t, (num_item, t_dim), jnp.float32)

    # deterministic bipartite edge list [(u, num_user + item), ...]
    edge_u_l, edge_i_l = [], []
    for u in range(num_user):
        for j in range(3):
            edge_u_l.append(u)
            edge_i_l.append(num_user + (u * 3 + j) % num_item)
    edge_u = jnp.asarray(edge_u_l, jnp.int32)
    edge_i_abs = jnp.asarray(edge_i_l, jnp.int32)

    item_tiles = adj_tiles(num_item)
    node_tiles = adj_tiles(num_user + num_item)

    # init-time KNN adjacencies: built at padded size, cast to bf16 exactly once
    image_adj_f32 = knn_normalized_adj(v_feat, knn_k, item_tiles[2])
    text_adj_f32 = knn_normalized_adj(t_feat, knn_k, item_tiles[2])
    mm_adj_p = (mm_image_weight * image_adj_f32
                + (1.0 - mm_image_weight) * text_adj_f32).astype(jnp.bfloat16)
    image_adj_p = image_adj_f32.astype(jnp.bfloat16)
    text_adj_p = text_adj_f32.astype(jnp.bfloat16)

    forward = jax.jit(functools.partial(
        ddrec_forward,
        num_user=num_user, num_item=num_item,
        n_layers=n_layers, mm_layers=mm_layers,
        item_tiles=item_tiles, node_tiles=node_tiles))

    result = forward(params, v_feat, t_feat, mm_adj_p, image_adj_p, text_adj_p,
                     edge_u, edge_i_abs, threshold)
    result = jax.block_until_ready(result)

    assert result.shape == (num_user + num_item, 3 * dim_E), result.shape
    assert bool(jnp.all(jnp.isfinite(result)))
    print("KERNEL_OK")
</pallas_src>

<mosaic_0001>
module attributes {stable_mosaic.version = 11 : i64} {
  func.func @_mm_kernel(%arg0: i32, %arg1: i32, %arg2: i32, %arg3: memref<16x128xbf16, #tpu.memory_space<vmem>>, %arg4: memref<128x128xbf16, #tpu.memory_space<vmem>>, %arg5: memref<16x128xf32, #tpu.memory_space<vmem>>, %arg6: memref<16x128xf32, #tpu.memory_space<vmem>>) attributes {dimension_semantics = [#tpu.dimension_semantics<parallel>, #tpu.dimension_semantics<parallel>, #tpu.dimension_semantics<arbitrary>], iteration_bounds = array<i64: 1, 1, 1>, scalar_prefetch = 0 : i64, scratch_operands = 1 : i64, tpu.core_type = #tpu.core_type<tc>, window_params = [{transform_indices = @transform_0, window_bounds = array<i64: 16, 128>}, {transform_indices = @transform_1, window_bounds = array<i64: 128, 128>}, {transform_indices = @transform_2, window_bounds = array<i64: 16, 128>}]} {
    %c0_i32 = arith.constant 0 : i32
    %0 = arith.cmpi eq, %arg2, %c0_i32 : i32
    %1 = arith.extui %0 : i1 to i32
    %c0_i32_0 = arith.constant 0 : i32
    %2 = arith.cmpi ne, %1, %c0_i32_0 : i32
    scf.if %2 {
      %cst_10 = arith.constant 0.000000e+00 : f32
      %12 = vector.broadcast %cst_10 : f32 to vector<16x128xf32>
      %c0_11 = arith.constant 0 : index
      %c0_12 = arith.constant 0 : index
      %13 = vector.load %arg6[%c0_11, %c0_12] : memref<16x128xf32, #tpu.memory_space<vmem>>, vector<16x128xf32>
      tpu.vector_store %arg6[%c0_11, %c0_12], %12 {strides = array<i32>} : memref<16x128xf32, #tpu.memory_space<vmem>>, vector<16x128xf32>,
    } else {
    }
    %c0 = arith.constant 0 : index
    %c0_1 = arith.constant 0 : index
    %3 = vector.load %arg6[%c0, %c0_1] : memref<16x128xf32, #tpu.memory_space<vmem>>, vector<16x128xf32>
    %c0_2 = arith.constant 0 : index
    %c0_3 = arith.constant 0 : index
    %4 = vector.load %arg3[%c0_2, %c0_3] : memref<16x128xbf16, #tpu.memory_space<vmem>>, vector<16x128xbf16>
    %c0_4 = arith.constant 0 : index
    %c0_5 = arith.constant 0 : index
    %5 = vector.load %arg4[%c0_4, %c0_5] : memref<128x128xbf16, #tpu.memory_space<vmem>>, vector<128x128xbf16>
    %cst = arith.constant dense<0.000000e+00> : vector<16x128xf32>
    %6 = tpu.matmul %4, %5, %cst {dimension_numbers = #tpu.dot_dimension_numbers<[1], [0], [0], [1], [0, 0, 1, 1], [], []>} : vector<16x128xbf16>, vector<128x128xbf16>, vector<16x128xf32> -> vector<16x128xf32>
    %7 = arith.addf %3, %6 : vector<16x128xf32>
    %c0_6 = arith.constant 0 : index
    %c0_7 = arith.constant 0 : index
    %8 = vector.load %arg6[%c0_6, %c0_7] : memref<16x128xf32, #tpu.memory_space<vmem>>, vector<16x128xf32>
    tpu.vector_store %arg6[%c0_6, %c0_7], %7 {strides = array<i32>} : memref<16x128xf32, #tpu.memory_space<vmem>>, vector<16x128xf32>,
    %c0_i32_8 = arith.constant 0 : i32
    %9 = arith.cmpi eq, %arg2, %c0_i32_8 : i32
    %10 = arith.extui %9 : i1 to i32
    %c0_i32_9 = arith.constant 0 : i32
    %11 = arith.cmpi ne, %10, %c0_i32_9 : i32
    scf.if %11 {
      %c0_10 = arith.constant 0 : index
      %c0_11 = arith.constant 0 : index
      %12 = vector.load %arg6[%c0_10, %c0_11] : memref<16x128xf32, #tpu.memory_space<vmem>>, vector<16x128xf32>
      %c0_12 = arith.constant 0 : index
      %c0_13 = arith.constant 0 : index
      %13 = vector.load %arg5[%c0_12, %c0_13] : memref<16x128xf32, #tpu.memory_space<vmem>>, vector<16x128xf32>
      tpu.vector_store %arg5[%c0_12, %c0_13], %12 {strides = array<i32>} : memref<16x128xf32, #tpu.memory_space<vmem>>, vector<16x128xf32>,
    } else {
    }
    return
  }
  func.func @transform_0(%arg0: i32, %arg1: i32, %arg2: i32) -> (i32, i32) {
    %c0_i32 = arith.constant 0 : i32
    return %arg0, %arg2 : i32, i32
  }
  func.func @transform_1(%arg0: i32, %arg1: i32, %arg2: i32) -> (i32, i32) {
    %c0_i32 = arith.constant 0 : i32
    return %arg2, %arg1 : i32, i32
  }
  func.func @transform_2(%arg0: i32, %arg1: i32, %arg2: i32) -> (i32, i32) {
    %c0_i32 = arith.constant 0 : i32
    return %arg0, %arg1 : i32, i32
  }
}

</mosaic_0001>

<bundles_post_ra>
// kernel: tpu_custom_call.1
= control target key start
LH: loop header
LB: loop body
LE: loop exit
PB: predicated region body
PF: predicated region fallthrough
CT: control target
= control target key end

     0   :  { %7 = vsyncpa [#allocation4], 0  ;;  %s330_s0 = inlined_call_operand.hbm [shape: bf16[16,128], index: 0, kind: input, shape index: {}]   ;;  %s331_s1 = inlined_call_operand.hbm [shape: bf16[128,128], index: 1, kind: input, shape index: {}]   ;;  %s332_s2 = inlined_call_operand.hbm [shape: f32[16,128], index: 2, kind: output, shape index: {}]  }
   0x1   :  { %8 = vsyncpa [#allocation7], 0 }
   0x2   :  { %9 = vsyncpa [#allocation5], 0  ;;  %s14_s11 = sshll.u32 %s330_s0, 4  ;;  %s299_s12 = smov [#allocation3]   ;;  %s15_s11 = int_to_ptr.hbm [resolvable:$true] %s14_s11 }
   0x3   :  { %s16_s13 = sshll.u32 %s299_s12, 4  ;;  %s27_s16 = sshll.u32 %s331_s1, 4  ;;  %s17_s13 = int_to_ptr.vmem [resolvable:$true] %s16_s13  ;;  %s28_s16 = int_to_ptr.hbm [resolvable:$true] %s27_s16 }
   0x4   :  { %s300_s17 = smov 64   ;;  %s301_s18 = smov 4  }
   0x5   :  { %22 = dma.hbm_to_vmem [thread:$0]  %s15_s11, 128, %s17_s13, [#allocation4], %s300_s17, %s300_s17, %s301_s18  }
   0x6   :  { %s302_s19 = smov [#allocation6]  }
   0x7   :  { %s29_s20 = sshll.u32 %s302_s19, 4  ;;  %s30_s20 = int_to_ptr.vmem [resolvable:$true] %s29_s20 }
   0x8   :  { %35 = dma.hbm_to_vmem [thread:$0]  %s28_s16, 1024, %s30_s20, [#allocation7], %s300_s17, %s300_s17, %s301_s18  }
   0x9   :  { %293 = dma.done.wait [#allocation4], 128  }
   0xa   :  { %294 = vsyncadd [#allocation4], 4294967168 }
   0xb   :  { %295 = dma.done.wait [#allocation7], 1024  }
   0xc   :  { %296 = vsyncadd [#allocation7], 4294966272  ;;  %v213_v0 = vld [vmem:[#allocation6 + $0x38] sm:$0xff]  ;;  %v212_v1 = vld [vmem:[#allocation6 + $0x30] sm:$0xff]  ;;  %s303_s0 = smov [#allocation8]   ;;  %s155_s23 = sshll.u32 %s332_s2, 4  ;;  %s156_s23 = int_to_ptr.hbm [resolvable:$true] %s155_s23 }
   0xd   :  { %124 = vmatpush.bf16.msra.mxu0 %v213_v0  ;;  %v211_v2 = vld [vmem:[#allocation6 + $0x28] sm:$0xff]  ;;  %v210_v3 = vld [vmem:[#allocation6 + $0x20] sm:$0xff]  ;;  %v209_v4 = vld [vmem:[#allocation6 + $0x18] sm:$0xff]  ;;  %s153_s1 = sshll.u32 %s303_s0, 4  ;;  %s304_s24 = smov 128   ;;  %s154_s1 = int_to_ptr.vmem [resolvable:$true] %s153_s1 }
   0xe   :  { %v208_v5 = vld [vmem:[#allocation6 + $0x10] sm:$0xff]  ;;  %v207_v6 = vld [vmem:[#allocation6 + $0x8] sm:$0xff]  ;;  %v206_v7 = vld [vmem:[#allocation6] sm:$0xff]  ;;  %s305_s25 = smov 8  }
   0xf   :  { %v205_v8 = vld [vmem:[#allocation3] sm:$0xff] }
  0x11   :  { %125 = vmatpush.bf16.msra.mxu0 %v212_v1 }
  0x15   :  { %126 = vmatpush.bf16.msra.mxu0 %v211_v2 }
  0x19   :  { %127 = vmatpush.bf16.msra.mxu0 %v210_v3 }
  0x1d   :  { %128 = vmatpush.bf16.msra.mxu0 %v209_v4 }
  0x21   :  { %129 = vmatpush.bf16.msra.mxu0 %v208_v5 }
  0x25   :  { %130 = vmatpush.bf16.msra.mxu0 %v207_v6 }
  0x29   :  { %131 = vmatpush.bf16.msra.mxu0 %v206_v7 }
  0x2c   :  { %132 = vmatmul.bf16.vlgmr.msra.gmra.mxu0 %v205_v8 }
  0xa9   :  { %v133_v9 = vpop.f32.mrf.mxu0 }
  0xaa   :  { %147 = vst [vmem:[#allocation8] sm:$0xff] %v133_v9 }
  0xb1   :  { %v135_v10 = vpop.f32.mrf.mxu0 }
  0xb2   :  { %148 = vst [vmem:[#allocation8 + $0x8] sm:$0xff] %v135_v10 }
  0xb3   :  { %161 = dma.vmem_to_hbm [thread:$0]  %s154_s1, 256, %s156_s23, [#allocation5], %s304_s24, %s304_s24, %s305_s25  }
  0xb4   :  { %297 = dma.done.wait [#allocation5], 256  }
  0xb5   :  { %298 = vsyncadd [#allocation5], 4294967040 }
  0xb6   :  { %166 = vsyncpa [#allocation4], 1 }
  0xb7   :  { %167 = vsyncpa [#allocation7], 1 }
  0xb8   :  { %168 = vsyncpa [#allocation5], 1 }

</bundles_post_ra>
